<compile_context>
chip_gen: v6e
topology: v6e:2x2x1
jax: 0.10.0
libtpu: 0.0.40
codegen_flags: <defaults>
</compile_context>

<pallas_src>
import functools

import jax
import jax.numpy as jnp
from jax.experimental import pallas as pl
from jax.experimental.pallas import tpu as pltpu

LANE = 128          # TPU lane width; hidden_dim / output_dim must be <= LANE
_NEG = -1.0e30      # bias for padded output lanes -> exp() underflows to 0


def _round_up(n, m):
    return ((n + m - 1) // m) * m


def _row_layout(d_in):
    """Row offsets of each packed tensor inside the [rows, 128] param buffer."""
    r_w1 = 0                          # [d_in, 128]  (cols >= h are zero)
    r_w2 = _round_up(d_in, 8)         # [128, 128]   (rows >= h, cols >= h zero)
    r_w3 = r_w2 + LANE                # [128, 128]   (rows >= h, cols >= out zero)
    r_b1 = r_w3 + LANE                # [1, 128]
    r_b2 = r_b1 + 8                   # [1, 128]  (8-row aligned slots)
    r_b3 = r_b2 + 8                   # [1, 128]  (cols >= out set to -1e30)
    total = r_b3 + 8
    return r_w1, r_w2, r_w3, r_b1, r_b2, r_b3, total


def pack_params(params, dtype=jnp.float32):
    """Pack (w1,b1,w2,b2,w3,b3) into a single [rows, 128] buffer (done ONCE).

    Weights are zero-padded to full 128-lane width so every in-kernel matmul
    and store is lane-dense; zero rows/cols guarantee padded lanes never
    contaminate real outputs.  Padded b3 lanes carry -1e30.
    """
    w1, b1, w2, b2, w3, b3 = params
    d_in, h = w1.shape
    d_out = w3.shape[1]
    assert h <= LANE and d_out <= LANE, "hidden/output dim must be <= 128"
    r_w1, r_w2, r_w3, r_b1, r_b2, r_b3, total = _row_layout(d_in)

    p = jnp.zeros((total, LANE), jnp.float32)
    p = p.at[r_w1:r_w1 + d_in, :h].set(w1.astype(jnp.float32))
    p = p.at[r_w2:r_w2 + h, :h].set(w2.astype(jnp.float32))
    p = p.at[r_w3:r_w3 + h, :d_out].set(w3.astype(jnp.float32))
    p = p.at[r_b1, :h].set(b1.reshape(-1).astype(jnp.float32))
    p = p.at[r_b2, :h].set(b2.reshape(-1).astype(jnp.float32))
    b3_row = jnp.full((LANE,), _NEG, jnp.float32)
    b3_row = b3_row.at[:d_out].set(b3.reshape(-1).astype(jnp.float32))
    p = p.at[r_b3, :].set(b3_row)
    return p.astype(dtype)


def _make_kernel(d_in):
    r_w1, r_w2, r_w3, r_b1, r_b2, r_b3, _ = _row_layout(d_in)

    def kernel(x_ref, p_ref, o_ref):
        x = x_ref[...]                                   # [bb, d_in]
        w1 = p_ref[r_w1:r_w1 + d_in, :]                  # [d_in, 128]
        w2 = p_ref[r_w2:r_w2 + LANE, :]                  # [128, 128]
        w3 = p_ref[r_w3:r_w3 + LANE, :]                  # [128, 128]
        b1 = p_ref[r_b1:r_b1 + 1, :].astype(jnp.float32)  # [1, 128]
        b2 = p_ref[r_b2:r_b2 + 1, :].astype(jnp.float32)
        b3 = p_ref[r_b3:r_b3 + 1, :].astype(jnp.float32)

        # Linear 1 + Sigmoid   (Dropout -> identity in eval mode)
        # sigmoid(x) = 0.5 * tanh(0.5 x) + 0.5 : single EUP tanh + 2 VPU ops.
        h1 = jnp.dot(x, w1, preferred_element_type=jnp.float32) + b1
        h1 = 0.5 * jnp.tanh(0.5 * h1) + 0.5

        # Linear 2 + Softsign  (Dropout -> identity in eval mode)
        # (padded h1 lanes are 0.5 but multiply zero rows of w2 -> no effect)
        h2 = jnp.dot(h1.astype(w2.dtype), w2,
                     preferred_element_type=jnp.float32) + b2
        d = 1.0 + jnp.abs(h2)
        r = pl.reciprocal(d, approx=True)     # EUP vrcp
        r = r * (2.0 - d * r)                 # one Newton step -> ~f32 accuracy
        h2 = h2 * r                           # softsign

        # Linear 3 + LogSoftmax(dim=-1); padded lanes get bias -1e30 -> exp==0
        logits = jnp.dot(h2.astype(w3.dtype), w3,
                         preferred_element_type=jnp.float32) + b3
        m = jnp.max(logits, axis=-1, keepdims=True)
        lse = jnp.log(jnp.sum(jnp.exp(logits - m), axis=-1, keepdims=True)) + m
        o_ref[...] = (logits - lse).astype(o_ref.dtype)   # [bb, 128] lane-dense

    return kernel


def _pick_tiling(B, block_b):
    """Row tile bb (multiple of 8) and padded batch b_pad.

    Guarantees >= 2 grid steps whenever B >= 16 so that on v7x both
    TensorCores get a share of the (parallel) batch axis.
    """
    assert block_b % 8 == 0 and block_b >= 8
    b8 = _round_up(B, 8)
    if b8 <= block_b:
        if b8 >= 16:
            b_pad = _round_up(b8, 16)
            return b_pad // 2, b_pad          # two equal tiles, minimal padding
        return b8, b8                          # tiny batch: single tile
    return block_b, _round_up(b8, block_b)     # large batch: grid >= 2 anyway


@functools.partial(jax.jit,
                   static_argnames=("d_in", "d_out", "block_b", "slice_output"))
def _arch_net_forward_impl(x, packed, *, d_in, d_out, block_b, slice_output):
    B = x.shape[0]
    assert x.shape[-1] == d_in
    x2d = x.reshape(B, x.shape[-1]).astype(packed.dtype)   # glue reshape (+bf16 opt)

    bb, b_pad = _pick_tiling(B, block_b)
    if b_pad != B:
        x2d = jnp.pad(x2d, ((0, b_pad - B), (0, 0)))

    out = pl.pallas_call(
        _make_kernel(d_in),
        out_shape=jax.ShapeDtypeStruct((b_pad, LANE), jnp.float32),
        grid=(b_pad // bb,),
        in_specs=[
            pl.BlockSpec((bb, d_in), lambda i: (i, 0)),        # x tiled over batch
            pl.BlockSpec(packed.shape, lambda i: (0, 0)),      # params: VMEM-resident
        ],
        out_specs=pl.BlockSpec((bb, LANE), lambda i: (i, 0)),  # lane-dense output slab
        compiler_params=pltpu.CompilerParams(
            dimension_semantics=("parallel",)),
    )(x2d, packed)

    if slice_output:
        return out[:B, :d_out]
    return out   # padded [b_pad, 128] slab (skip the slice copy if caller can)


def make_arch_net_forward(params, *, block_b=1024, param_dtype=jnp.float32,
                          slice_output=True):
    """Pack params ONCE and return a jitted forward: x[B,1,in] -> [B,out]."""
    packed = pack_params(params, dtype=param_dtype)
    d_in = params[0].shape[0]
    d_out = params[4].shape[1]

    def forward(x):
        return _arch_net_forward_impl(x, packed, d_in=d_in, d_out=d_out,
                                      block_b=block_b, slice_output=slice_output)

    return forward


def init_params(key, input_size, hidden_dim, output_dim):
    """Deterministic synthetic params; weights stored [in, out], biases [1, out]."""
    ks = jax.random.split(key, 6)

    def lin(kw, kb, fan_in, fan_out):
        bound = 1.0 / jnp.sqrt(fan_in)
        w = jax.random.uniform(kw, (fan_in, fan_out), jnp.float32, -bound, bound)
        b = jax.random.uniform(kb, (1, fan_out), jnp.float32, -bound, bound)
        return w, b

    w1, b1 = lin(ks[0], ks[1], input_size, hidden_dim)
    w2, b2 = lin(ks[2], ks[3], hidden_dim, hidden_dim)
    w3, b3 = lin(ks[4], ks[5], hidden_dim, output_dim)
    return (w1, b1, w2, b2, w3, b3)


def reference_forward(x, params):
    """Pure-JAX reference (eval-mode) for correctness checking."""
    w1, b1, w2, b2, w3, b3 = params
    h = x.reshape(x.shape[0], x.shape[-1])
    h = jax.nn.sigmoid(h @ w1 + b1)
    h = h @ w2 + b2
    h = h / (1.0 + jnp.abs(h))
    logits = h @ w3 + b3
    return jax.nn.log_softmax(logits, axis=-1)


if __name__ == "__main__":
    # Small shapes consistent with the module's forward.
    batch, input_size, hidden_dim, output_dim = 8, 32, 16, 16

    key = jax.random.PRNGKey(0)
    k_x, k_p, k_x2 = jax.random.split(key, 3)
    params = init_params(k_p, input_size, hidden_dim, output_dim)

    # Pack + jit once (hoisted out of the per-call path).
    forward = make_arch_net_forward(params)

    # --- check 1: single-tile path ---
    x = jax.random.normal(k_x, (batch, 1, input_size), jnp.float32)
    out = jax.block_until_ready(forward(x))
    ref = reference_forward(x, params)
    assert out.shape == (batch, output_dim), out.shape
    max_err = float(jnp.max(jnp.abs(out - ref)))
    assert jnp.allclose(out, ref, atol=1e-4, rtol=1e-4), max_err
    assert jnp.allclose(jnp.sum(jnp.exp(out), axis=-1), 1.0, atol=1e-4)

    # --- check 2: multi-step grid (2 tiles) + batch-padding path ---
    x2 = jax.random.normal(k_x2, (100, 1, input_size), jnp.float32)
    out2 = jax.block_until_ready(forward(x2))
    ref2 = reference_forward(x2, params)
    assert out2.shape == (100, output_dim), out2.shape
    max_err2 = float(jnp.max(jnp.abs(out2 - ref2)))
    assert jnp.allclose(out2, ref2, atol=1e-4, rtol=1e-4), max_err2

    print("KERNEL_OK")
</pallas_src>

<mosaic_0001>
module attributes {stable_mosaic.version = 11 : i64} {
  func.func @kernel(%arg0: i32, %arg1: memref<8x32xf32, #tpu.memory_space<vmem>>, %arg2: memref<312x128xf32, #tpu.memory_space<vmem>>, %arg3: memref<8x128xf32, #tpu.memory_space<vmem>>) attributes {dimension_semantics = [#tpu.dimension_semantics<parallel>], iteration_bounds = array<i64: 1>, scalar_prefetch = 0 : i64, scratch_operands = 0 : i64, tpu.core_type = #tpu.core_type<tc>, window_params = [{transform_indices = @transform_0, window_bounds = array<i64: 8, 32>}, {pipeline_mode = #tpu.pipeline_mode<synchronous>, transform_indices = @transform_1, window_bounds = array<i64: 312, 128>}, {transform_indices = @transform_2, window_bounds = array<i64: 8, 128>}]} {
    %c0 = arith.constant 0 : index
    %c0_0 = arith.constant 0 : index
    %0 = vector.load %arg1[%c0, %c0_0] : memref<8x32xf32, #tpu.memory_space<vmem>>, vector<8x32xf32>
    %c0_1 = arith.constant 0 : index
    %c0_2 = arith.constant 0 : index
    %1 = vector.load %arg2[%c0_1, %c0_2] : memref<312x128xf32, #tpu.memory_space<vmem>>, vector<32x128xf32>
    %c32 = arith.constant 32 : index
    %c0_3 = arith.constant 0 : index
    %2 = vector.load %arg2[%c32, %c0_3] : memref<312x128xf32, #tpu.memory_space<vmem>>, vector<128x128xf32>
    %c160 = arith.constant 160 : index
    %c0_4 = arith.constant 0 : index
    %3 = vector.load %arg2[%c160, %c0_4] : memref<312x128xf32, #tpu.memory_space<vmem>>, vector<128x128xf32>
    %c288 = arith.constant 288 : index
    %c0_5 = arith.constant 0 : index
    %4 = vector.load %arg2[%c288, %c0_5] : memref<312x128xf32, #tpu.memory_space<vmem>>, vector<1x128xf32>
    %c296 = arith.constant 296 : index
    %c0_6 = arith.constant 0 : index
    %5 = vector.load %arg2[%c296, %c0_6] : memref<312x128xf32, #tpu.memory_space<vmem>>, vector<1x128xf32>
    %c304 = arith.constant 304 : index
    %c0_7 = arith.constant 0 : index
    %6 = vector.load %arg2[%c304, %c0_7] : memref<312x128xf32, #tpu.memory_space<vmem>>, vector<1x128xf32>
    %cst = arith.constant dense<0.000000e+00> : vector<8x128xf32>
    %7 = tpu.matmul %0, %1, %cst {dimension_numbers = #tpu.dot_dimension_numbers<[1], [0], [0], [1], [0, 0, 1, 1], [], []>} : vector<8x32xf32>, vector<32x128xf32>, vector<8x128xf32> -> vector<8x128xf32>
    %8 = vector.broadcast %4 : vector<1x128xf32> to vector<8x128xf32>
    %9 = arith.addf %7, %8 : vector<8x128xf32>
    %cst_8 = arith.constant 5.000000e-01 : f32
    %10 = vector.broadcast %cst_8 : f32 to vector<8x128xf32>
    %11 = arith.mulf %10, %9 : vector<8x128xf32>
    %12 = math.tanh %11 : vector<8x128xf32>
    %cst_9 = arith.constant 5.000000e-01 : f32
    %13 = vector.broadcast %cst_9 : f32 to vector<8x128xf32>
    %14 = arith.mulf %13, %12 : vector<8x128xf32>
    %cst_10 = arith.constant 5.000000e-01 : f32
    %15 = vector.broadcast %cst_10 : f32 to vector<8x128xf32>
    %16 = arith.addf %14, %15 : vector<8x128xf32>
    %cst_11 = arith.constant dense<0.000000e+00> : vector<8x128xf32>
    %17 = tpu.matmul %16, %2, %cst_11 {dimension_numbers = #tpu.dot_dimension_numbers<[1], [0], [0], [1], [0, 0, 1, 1], [], []>} : vector<8x128xf32>, vector<128x128xf32>, vector<8x128xf32> -> vector<8x128xf32>
    %18 = vector.broadcast %5 : vector<1x128xf32> to vector<8x128xf32>
    %19 = arith.addf %17, %18 : vector<8x128xf32>
    %20 = math.absf %19 : vector<8x128xf32>
    %cst_12 = arith.constant 1.000000e+00 : f32
    %21 = vector.broadcast %cst_12 : f32 to vector<8x128xf32>
    %22 = arith.addf %21, %20 : vector<8x128xf32>
    %23 = tpu.reciprocal %22 {approx = true} : vector<8x128xf32> -> vector<8x128xf32>
    %24 = arith.mulf %22, %23 : vector<8x128xf32>
    %cst_13 = arith.constant 2.000000e+00 : f32
    %25 = vector.broadcast %cst_13 : f32 to vector<8x128xf32>
    %26 = arith.subf %25, %24 : vector<8x128xf32>
    %27 = arith.mulf %23, %26 : vector<8x128xf32>
    %28 = arith.mulf %19, %27 : vector<8x128xf32>
    %cst_14 = arith.constant dense<0.000000e+00> : vector<8x128xf32>
    %29 = tpu.matmul %28, %3, %cst_14 {dimension_numbers = #tpu.dot_dimension_numbers<[1], [0], [0], [1], [0, 0, 1, 1], [], []>} : vector<8x128xf32>, vector<128x128xf32>, vector<8x128xf32> -> vector<8x128xf32>
    %30 = vector.broadcast %6 : vector<1x128xf32> to vector<8x128xf32>
    %31 = arith.addf %29, %30 : vector<8x128xf32>
    %cst_15 = arith.constant dense<0xFF800000> : vector<8xf32>
    %32 = vector.multi_reduction <maximumf>, %31, %cst_15 [1] : vector<8x128xf32> to vector<8xf32>
    %33 = vector.shape_cast %32 : vector<8xf32> to vector<8x1xf32>
    %34 = vector.broadcast %33 : vector<8x1xf32> to vector<8x128xf32>
    %35 = arith.subf %31, %34 : vector<8x128xf32>
    %36 = math.exp %35 : vector<8x128xf32>
    %cst_16 = arith.constant dense<0.000000e+00> : vector<8xf32>
    %37 = vector.multi_reduction <add>, %36, %cst_16 [1] : vector<8x128xf32> to vector<8xf32>
    %38 = vector.shape_cast %37 : vector<8xf32> to vector<8x1xf32>
    %39 = math.log %38 : vector<8x1xf32>
    %40 = arith.addf %39, %33 : vector<8x1xf32>
    %41 = vector.broadcast %40 : vector<8x1xf32> to vector<8x128xf32>
    %42 = arith.subf %31, %41 : vector<8x128xf32>
    %c0_17 = arith.constant 0 : index
    %c0_18 = arith.constant 0 : index
    %43 = vector.load %arg3[%c0_17, %c0_18] : memref<8x128xf32, #tpu.memory_space<vmem>>, vector<8x128xf32>
    tpu.vector_store %arg3[%c0_17, %c0_18], %42 {strides = array<i32>} : memref<8x128xf32, #tpu.memory_space<vmem>>, vector<8x128xf32>,
    return
  }
  func.func @transform_0(%arg0: i32) -> (i32, i32) {
    %c0_i32 = arith.constant 0 : i32
    %c0_i32_0 = arith.constant 0 : i32
    return %arg0, %c0_i32 : i32, i32
  }
  func.func @transform_1(%arg0: i32) -> (i32, i32) {
    %c0_i32 = arith.constant 0 : i32
    %c0_i32_0 = arith.constant 0 : i32
    %c0_i32_1 = arith.constant 0 : i32
    return %c0_i32, %c0_i32_0 : i32, i32
  }
  func.func @transform_2(%arg0: i32) -> (i32, i32) {
    %c0_i32 = arith.constant 0 : i32
    %c0_i32_0 = arith.constant 0 : i32
    return %arg0, %c0_i32 : i32, i32
  }
}

</mosaic_0001>

<bundles_post_ra>
// kernel: _arch_net_forward_impl.1
= control target key start
LH: loop header
LB: loop body
LE: loop exit
PB: predicated region body
PF: predicated region fallthrough
CT: control target
= control target key end

     0   :  { %7 = vsyncpa [#allocation3], 0  ;;  %s621_s0 = inlined_call_operand.hbm [shape: f32[8,32], index: 0, kind: input, shape index: {}]   ;;  %s622_s1 = inlined_call_operand.hbm [shape: f32[312,128], index: 1, kind: input, shape index: {}]   ;;  %s623_s2 = inlined_call_operand.hbm [shape: f32[8,128], index: 2, kind: output, shape index: {}]  }
   0x1   :  { %8 = vsyncpa [#allocation6], 0 }
   0x2   :  { %9 = vsyncpa [#allocation4], 0  ;;  %s548_s9 = smov [#allocation2]   ;;  %s549_s11 = smov [#allocation5]  }
   0x3   :  { %s16_s10 = sshll.u32 %s548_s9, 4  ;;  %s25_s12 = sshll.u32 %s549_s11, 4  ;;  %s17_s10 = int_to_ptr.vmem [resolvable:$true] %s16_s10  ;;  %s26_s12 = int_to_ptr.vmem [resolvable:$true] %s25_s12 }
   0x4   :  { %s490_s13 = scalar_lea.vmem %s17_s10, 128  ;;  %p495_p1 = scmp.lt.s32.totalorder %s17_s10, %s17_s10 }
   0x5   :  { %p491_p0 = scmp.ne.s32.totalorder %s17_s10, %s490_s13  ;;  %p496_p2 = scmp.lt.s32.totalorder %s490_s13, %s490_s13 }
   0x7   :  { %p497_p3 = por %p496_p2, %p495_p1 }
   0x9   :  { %p498_p4 = pnand %p497_p3, %p491_p0 }
   0xb   :  { %501 = shalt.err (!%p498_p4)
}
   0xc   :  { %19 = dma.hbm_to_vmem [thread:$0]  %s621_s0, 128, %s17_s10, [#allocation3]  }
   0xd   :  { %s510_s16 = scalar_lea.vmem %s26_s12, 4992  ;;  %p515_p6 = scmp.lt.s32.totalorder %s26_s12, %s26_s12 }
   0xe   :  { %p511_p5 = scmp.ne.s32.totalorder %s26_s12, %s510_s16  ;;  %p516_p7 = scmp.lt.s32.totalorder %s510_s16, %s510_s16 }
  0x10   :  { %p517_p8 = por %p516_p7, %p515_p6 }
  0x12   :  { %p518_p9 = pnand %p517_p8, %p511_p5 }
  0x14   :  { %521 = shalt.err (!%p518_p9)
}
  0x15   :  { %s550_s17 = smov 128   ;;  %s551_s18 = smov 8  }
  0x16   :  { %31 = dma.hbm_to_vmem [thread:$0]  %s622_s1, 4992, %s26_s12, [#allocation6], %s550_s17, %s550_s17, %s551_s18  }
  0x17   :  { %542 = dma.done.wait [#allocation3], 128  }
  0x18   :  { %543 = vsyncadd [#allocation3], 4294967168 }
  0x19   :  { %544 = dma.done.wait [#allocation6], 4992  }
  0x1a   :  { %545 = vsyncadd [#allocation6], 4294962304  ;;  %v552_v0 = vmov 0.0   ;;  %vm553_vm0 = vmmov 0   ;;  %v42_v1 = vld [vmem:[#allocation5 + $0x18] sm:$0xff]  ;;  %v41_v2 = vld [vmem:[#allocation5 + $0x10] sm:$0xff] }
  0x1b   :  { %386 = vmatprep.subr.mxu0 %v552_v0  ;;  %394 = vmatprep.mubr.msk.f32.mxu0 %vm553_vm0, %v552_v0  ;;  %v58_v3 = vld [vmem:[#allocation5 + $0x98] sm:$0xff]  ;;  %v40_v4 = vld [vmem:[#allocation5 + $0x8] sm:$0xff]  ;;  %v57_v5 = vld [vmem:[#allocation5 + $0x90] sm:$0xff]  ;;  %vm82_vm1 = vcmask 261120   ;;  %s554_s0 = smov [#allocation7]  }
  0x1c   :  { %397 = vmatprep.subr.mxu1 %v552_v0  ;;  %429 = vmatprep.mubr.msk.f32.mxu1 %vm553_vm0, %v552_v0  ;;  %v56_v6 = vld [vmem:[#allocation5 + $0x88] sm:$0xff]  ;;  %v39_v7 = vld [vmem:[#allocation5] sm:$0xff]  ;;  %v38_v8 = vld [vmem:[#allocation2] sm:$0xff]  ;;  %s333_s1 = sshll.u32 %s554_s0, 4  ;;  %s334_s1 = int_to_ptr.vmem [resolvable:$true] %s333_s1 }
  0x1d   :  { %387 = vmatpush3.msra.mxu0 %v42_v1  ;;  %398 = vmatpush3.msra.mxu1 %v58_v3  ;;  %v55_v9 = vld [vmem:[#allocation5 + $0x80] sm:$0xff]  ;;  %v54_v10 = vld [vmem:[#allocation5 + $0x78] sm:$0xff]  ;;  %v53_v11 = vld [vmem:[#allocation5 + $0x70] sm:$0xff]  ;;  %s522_s21 = scalar_lea.vmem %s334_s1, 128  ;;  %p527_p11 = scmp.lt.s32.totalorder %s334_s1, %s334_s1 }
  0x1e   :  { %388 = vmatprep.subr.mxu0 %v552_v0  ;;  %399 = vmatprep.subr.mxu1 %v552_v0  ;;  %v52_v12 = vld [vmem:[#allocation5 + $0x68] sm:$0xff]  ;;  %v51_v13 = vld [vmem:[#allocation5 + $0x60] sm:$0xff]  ;;  %v50_v14 = vld [vmem:[#allocation5 + $0x58] sm:$0xff]  ;;  %p523_p10 = scmp.ne.s32.totalorder %s334_s1, %s522_s21  ;;  %p528_p12 = scmp.lt.s32.totalorder %s522_s21, %s522_s21 }
  0x1f   :  { %389 = vmatpush3.msra.mxu0 %v41_v2  ;;  %400 = vmatpush3.msra.mxu1 %v57_v5  ;;  %v49_v15 = vld [vmem:[#allocation5 + $0x50] sm:$0xff]  ;;  %v48_v16 = vld [vmem:[#allocation5 + $0x48] sm:$0xff]  ;;  %v47_v17 = vld [vmem:[#allocation5 + $0x40] sm:$0xff] }
  0x20   :  { %390 = vmatprep.subr.mxu0 %v552_v0  ;;  %401 = vmatprep.subr.mxu1 %v552_v0  ;;  %v46_v18 = vld [vmem:[#allocation5 + $0x38] sm:$0xff]  ;;  %v45_v19 = vld [vmem:[#allocation5 + $0x30] sm:$0xff]  ;;  %v44_v20 = vld [vmem:[#allocation5 + $0x28] sm:$0xff]  ;;  %p529_p13 = por %p528_p12, %p527_p11 }
  0x21   :  { %391 = vmatpush3.msra.mxu0 %v40_v4  ;;  %402 = vmatpush3.msra.mxu1 %v56_v6  ;;  %v43_v21 = vld [vmem:[#allocation5 + $0x20] sm:$0xff]  ;;  %v74_v22 = vld [vmem:[#allocation5 + $0x118] sm:$0xff]  ;;  %v73_v31 = vld [vmem:[#allocation5 + $0x110] sm:$0xff] }
  0x22   :  { %392 = vmatprep.subr.mxu0 %v552_v0  ;;  %403 = vmatprep.subr.mxu1 %v552_v0  ;;  %v343_v23 = vld [vmem:[#allocation5 + $0x120] ss:$0 sm:$0xff]  ;;  %v72_v32 = vld [vmem:[#allocation5 + $0x108] sm:$0xff]  ;;  %v70_v34 = vld [vmem:[#allocation5 + $0xf8] sm:$0xff]  ;;  %p530_p0 = pnand %p529_p13, %p523_p10 }
  0x23   :  { %393 = vmatpush3.msra.mxu0 %v39_v7  ;;  %404 = vmatpush3.msra.mxu1 %v55_v9  ;;  %v71_v33 = vld [vmem:[#allocation5 + $0x100] sm:$0xff]  ;;  %v69_v35 = vld [vmem:[#allocation5 + $0xf0] sm:$0xff]  ;;  %v68_v36 = vld [vmem:[#allocation5 + $0xe8] sm:$0xff] }
  0x24   :  { %395 = vmatmul.mubr.msk.f32.vlgmr.msra.gmra.mxu0 %vm82_vm1, %v38_v8  ;;  %405 = vmatprep.subr.mxu1 %v552_v0  ;;  %v67_v37 = vld [vmem:[#allocation5 + $0xe0] sm:$0xff]  ;;  %v66_v38 = vld [vmem:[#allocation5 + $0xd8] sm:$0xff]  ;;  %v65_v39 = vld [vmem:[#allocation5 + $0xd0] sm:$0xff] }
  0x25   :  { %432 = vmatprep.subr.mxu0 %v552_v0  ;;  %464 = vmatprep.mubr.msk.f32.mxu0 %vm553_vm0, %v552_v0  ;;  %v64_v40 = vld [vmem:[#allocation5 + $0xc8] sm:$0xff]  ;;  %v63_v41 = vld [vmem:[#allocation5 + $0xc0] sm:$0xff]  ;;  %v62_v42 = vld [vmem:[#allocation5 + $0xb8] sm:$0xff] }
  0x26   :  { %406 = vmatpush3.msra.mxu1 %v54_v10  ;;  %433 = vmatpush3.msra.mxu0 %v74_v22  ;;  %v61_v43 = vld [vmem:[#allocation5 + $0xb0] sm:$0xff]  ;;  %v60_v44 = vld [vmem:[#allocation5 + $0xa8] sm:$0xff]  ;;  %v59_v45 = vld [vmem:[#allocation5 + $0xa0] sm:$0xff] }
  0x27   :  { %407 = vmatprep.subr.mxu1 %v552_v0  ;;  %434 = vmatprep.subr.mxu0 %v552_v0  ;;  %v345_v46 = vld [vmem:[#allocation5 + $0x128] ss:$0 sm:$0xff]  ;;  %v346_v57 = vld [vmem:[#allocation5 + $0x130] ss:$0 sm:$0xff] }
  0x28   :  { %408 = vmatpush3.msra.mxu1 %v53_v11  ;;  %435 = vmatpush3.msra.mxu0 %v73_v31 }
  0x29   :  { %409 = vmatprep.subr.mxu1 %v552_v0  ;;  %436 = vmatprep.subr.mxu0 %v552_v0 }
  0x2a   :  { %410 = vmatpush3.msra.mxu1 %v52_v12  ;;  %437 = vmatpush3.msra.mxu0 %v72_v32 }
  0x2b   :  { %411 = vmatprep.subr.mxu1 %v552_v0  ;;  %438 = vmatprep.subr.mxu0 %v552_v0 }
  0x2c   :  { %412 = vmatpush3.msra.mxu1 %v51_v13  ;;  %439 = vmatpush3.msra.mxu0 %v71_v33 }
  0x2d   :  { %413 = vmatprep.subr.mxu1 %v552_v0  ;;  %440 = vmatprep.subr.mxu0 %v552_v0 }
  0x2e   :  { %414 = vmatpush3.msra.mxu1 %v50_v14  ;;  %441 = vmatpush3.msra.mxu0 %v70_v34 }
  0x2f   :  { %415 = vmatprep.subr.mxu1 %v552_v0  ;;  %442 = vmatprep.subr.mxu0 %v552_v0 }
  0x30   :  { %416 = vmatpush3.msra.mxu1 %v49_v15  ;;  %443 = vmatpush3.msra.mxu0 %v69_v35 }
  0x31   :  { %417 = vmatprep.subr.mxu1 %v552_v0  ;;  %444 = vmatprep.subr.mxu0 %v552_v0 }
  0x32   :  { %418 = vmatpush3.msra.mxu1 %v48_v16  ;;  %445 = vmatpush3.msra.mxu0 %v68_v36 }
  0x33   :  { %419 = vmatprep.subr.mxu1 %v552_v0  ;;  %446 = vmatprep.subr.mxu0 %v552_v0 }
  0x34   :  { %420 = vmatpush3.msra.mxu1 %v47_v17  ;;  %447 = vmatpush3.msra.mxu0 %v67_v37 }
  0x35   :  { %421 = vmatprep.subr.mxu1 %v552_v0  ;;  %448 = vmatprep.subr.mxu0 %v552_v0 }
  0x36   :  { %422 = vmatpush3.msra.mxu1 %v46_v18  ;;  %449 = vmatpush3.msra.mxu0 %v66_v38 }
  0x37   :  { %423 = vmatprep.subr.mxu1 %v552_v0  ;;  %450 = vmatprep.subr.mxu0 %v552_v0 }
  0x38   :  { %424 = vmatpush3.msra.mxu1 %v45_v19  ;;  %451 = vmatpush3.msra.mxu0 %v65_v39 }
  0x39   :  { %425 = vmatprep.subr.mxu1 %v552_v0  ;;  %452 = vmatprep.subr.mxu0 %v552_v0 }
  0x3a   :  { %426 = vmatpush3.msra.mxu1 %v44_v20  ;;  %453 = vmatpush3.msra.mxu0 %v64_v40 }
  0x3b   :  { %427 = vmatprep.subr.mxu1 %v552_v0  ;;  %454 = vmatprep.subr.mxu0 %v552_v0 }
  0x3c   :  { %428 = vmatpush3.msra.mxu1 %v43_v21  ;;  %455 = vmatpush3.msra.mxu0 %v63_v41 }
  0x3d   :  { %456 = vmatprep.subr.mxu0 %v552_v0 }
  0x3e   :  { %457 = vmatpush3.msra.mxu0 %v62_v42 }
  0x3f   :  { %458 = vmatprep.subr.mxu0 %v552_v0 }
  0x40   :  { %459 = vmatpush3.msra.mxu0 %v61_v43 }
  0x41   :  { %460 = vmatprep.subr.mxu0 %v552_v0 }
  0x42   :  { %461 = vmatpush3.msra.mxu0 %v60_v44 }
  0x43   :  { %462 = vmatprep.subr.mxu0 %v552_v0 }
  0x44   :  { %463 = vmatpush3.msra.mxu0 %v59_v45 }
  0xe4   :  { %v152_v24 = vpop.f32.mrf.mxu0 }
  0xe5   :  { %v153_v25 = vadd.f32 %v343_v23, %v152_v24 }
  0xe6   :  { %v396_v26 = vpop.f32.mrf.mxu0 }
  0xe7   :  { %v156_v27 = vmul.f32 0.5, %v153_v25 }
  0xe9   :  { %474 = vtanh.f32 %v156_v27 }
  0xf6   :  { %v475_v28 = vpop.eup %474 }
  0xf7   :  { %v158_v29 = vmul.f32 0.5, %v475_v28 }
  0xf9   :  { %v159_v30 = vadd.f32 0.5, %v158_v29 }
  0xfb   :  { %430 = vmatmul.mubr.f32.vlgmr.msra.gmra.mxu1 %v159_v30 }
 0x1bb   :  { %v230_v47 = vpop.f32.mrf.mxu1 }
 0x1bc   :  { %v231_v48 = vadd.f32 %v345_v46, %v230_v47 }
 0x1bd   :  { %v431_v49 = vpop.f32.mrf.mxu1 }
 0x1be   :  { %v234_v50 = vand.u32 2147483647, %v231_v48 }
 0x1c0   :  { %v235_v51 = vadd.f32 1.0, %v234_v50 }
 0x1c2   :  { %476 = vrcp.f32 %v235_v51 }
 0x1cf   :  { %v477_v52 = vpop.eup %476 }
 0x1d0   :  { %v237_v53 = vmul.f32 %v477_v52, %v235_v51 }
 0x1d2   :  { %v238_v54 = vsub.f32 2.0, %v237_v53 }
 0x1d4   :  { %v239_v55 = vmul.f32 %v477_v52, %v238_v54 }
 0x1d6   :  { %v240_v56 = vmul.f32 %v239_v55, %v231_v48 }
 0x1d8   :  { %465 = vmatmul.mubr.f32.vlgmr.msra.gmra.mxu0 %v240_v56 }
 0x298   :  { %v311_v58 = vpop.f32.mrf.mxu0 }
 0x299   :  { %v312_v59 = vadd.f32 %v346_v57, %v311_v58 }
 0x29a   :  { %v466_v60 = vpop.f32.mrf.mxu0 }
 0x29b   :  { %315 = vmax.xlane.f32.xlu0 %v312_v59 }
 0x324   :  { %v316_v61 = vpop.xlane.xlu0 %315 }
 0x325   :  { %v317_v62 = vsub.f32 %v312_v59, %v316_v61 }
 0x327   :  { %v318_v63 = vmul.f32 1.442695, %v317_v62 }
 0x329   :  { %478 = vpow2.f32 %v318_v63 }
 0x336   :  { %v479_v0 = vpop.eup %478 }
 0x337   :  { %320 = vadd.xlane.f32.xlu0 %v479_v0 }
 0x3c0   :  { %v321_v1 = vpop.xlane.xlu0 %320 }
 0x3c1   :  { %480 = vlog2.f32 %v321_v1 }
 0x3ce   :  { %v481_v2 = vpop.eup %480 }
 0x3cf   :  { %v323_v3 = vmul.f32 0.6931472, %v481_v2 }
 0x3d1   :  { %v324_v4 = vadd.f32 %v323_v3, %v316_v61 }
 0x3d3   :  { %v325_v5 = vsub.f32 %v312_v59, %v324_v4 }
 0x3d5   :  { %326 = vst [vmem:[#allocation7] sm:$0xff] %v325_v5 }
 0x3d6   :  { %533 = shalt.err (!%p530_p0)
}
 0x3d7   :  { %336 = dma.vmem_to_hbm [thread:$0]  %s334_s1, 128, %s623_s2, [#allocation4]  }
 0x3d8   :  { %546 = dma.done.wait [#allocation4], 128  }
 0x3d9   :  { %547 = vsyncadd [#allocation4], 4294967168 }
 0x3da   :  { %340 = vsyncpa [#allocation3], 1 }
 0x3db   :  { %341 = vsyncpa [#allocation6], 1 }
 0x3dc   :  { %342 = vsyncpa [#allocation4], 1 }

</bundles_post_ra>
